<compile_context>
chip_gen: v6e
topology: v6e:2x2x1
jax: 0.10.0
libtpu: 0.0.40
codegen_flags: <defaults>
</compile_context>

<pallas_src>
import functools

import jax
import jax.numpy as jnp
import numpy as np
from jax import lax
from jax.experimental import pallas as pl
from jax.experimental.pallas import tpu as pltpu


# ----------------------------------------------------------------------------
# Fused kernel: one-hot embedding gather -> batched input projection ->
# masked LSTM recurrence (unrolled) -> concat-FC -> log-softmax.
# ----------------------------------------------------------------------------
def _fused_kernel(tok_ref, lens_ref, embed_ref, wih_ref, whh_ref, b_ref,
                  wfc_ref, bfc_ref, out_ref, *, T, B, H, VOCAB):
    B2 = 2 * B

    # ---- Embedding gather as a one-hot matmul (vectorized, runs on idle MXU) ----
    toks = tok_ref[...]                                           # (T*B2, 1) int32
    onehot = (toks == lax.broadcasted_iota(jnp.int32, (T * B2, VOCAB), 1)
              ).astype(jnp.float32)                               # (T*B2, VOCAB)
    x = jnp.dot(onehot, embed_ref[...],
                preferred_element_type=jnp.float32)               # (T*B2, E)

    # ---- Hoisted input projection + bias: ONE matmul over all (t, b) ----
    gates_x = (jnp.dot(x, wih_ref[...], preferred_element_type=jnp.float32)
               + b_ref[...])                                      # (T*B2, 4H)

    lens_v = lens_ref[...]                                        # (B2, 1) int32
    h = jnp.zeros((B2, H), jnp.float32)
    c = jnp.zeros((B2, H), jnp.float32)

    # ---- Recurrence: statically unrolled, only h @ whh on the sequential chain ----
    for t in range(T):
        g = gates_x[t * B2:(t + 1) * B2, :] + jnp.dot(
            h, whh_ref[...], preferred_element_type=jnp.float32)  # (B2, 4H)

        # PyTorch LSTM gate order: i, f, g, o
        i_g = jax.nn.sigmoid(g[:, 0:H])
        f_g = jax.nn.sigmoid(g[:, H:2 * H])
        g_g = jnp.tanh(g[:, 2 * H:3 * H])
        o_g = jax.nn.sigmoid(g[:, 3 * H:4 * H])

        c_new = f_g * c + i_g * g_g
        h_new = o_g * jnp.tanh(c_new)

        # Only update state while t < len[b] (packed-sequence h_n semantics).
        mask = lens_v > t                                         # (B2, 1) bool
        h = jnp.where(mask, h_new, h)
        c = jnp.where(mask, c_new, c)

    # ---- Fused concat-FC + LogSoftmax(dim=1) epilogue ----
    # cat([h_sf, h_lf], 1) @ W_fc.T + b  ==  h[:B] @ Wt[:H] + h[B:] @ Wt[H:] + b
    wfc = wfc_ref[...]                                            # (2H, O)
    z = (jnp.dot(h[:B], wfc[:H], preferred_element_type=jnp.float32)
         + jnp.dot(h[B:], wfc[H:], preferred_element_type=jnp.float32)
         + bfc_ref[...])                                          # (B, O)
    m = jnp.max(z, axis=1, keepdims=True)
    lse = m + jnp.log(jnp.sum(jnp.exp(z - m), axis=1, keepdims=True))
    out_ref[...] = z - lse


def fused_forward(toks, lens, embed, wih_t, whh_t, b_lstm, w_fc_t, b_fc, *, T, B):
    """toks: (T*2B, 1) int32 (sf cols then lf cols, row-major over t); lens: (2B, 1) int32.
    embed: (VOCAB, E); wih_t: (E, 4H); whh_t: (H, 4H); b_lstm: (1, 4H);
    w_fc_t: (2H, O); b_fc: (1, O). Returns (B, O) log-probs."""
    VOCAB, _ = embed.shape
    H = whh_t.shape[0]
    O = w_fc_t.shape[1]
    kernel = functools.partial(_fused_kernel, T=T, B=B, H=H, VOCAB=VOCAB)
    vmem = pl.BlockSpec(memory_space=pltpu.MemorySpace.VMEM)      # whole array in VMEM
    return pl.pallas_call(
        kernel,
        out_shape=jax.ShapeDtypeStruct((B, O), jnp.float32),
        in_specs=[vmem] * 8,
        out_specs=vmem,
    )(toks, lens, embed, wih_t, whh_t, b_lstm, w_fc_t, b_fc)


# ----------------------------------------------------------------------------
# Full forward (only reshape/concat plumbing outside the kernel).
# ----------------------------------------------------------------------------
@jax.jit
def toy_embed_rnn_forward(params, sfs, lfs, sf_lens, lf_lens):
    Ts, B = sfs.shape
    Tl, _ = lfs.shape
    T = max(Ts, Tl)                                   # static under jit
    sfs_p = jnp.pad(sfs, ((0, T - Ts), (0, 0)))       # padded tokens are masked by lens
    lfs_p = jnp.pad(lfs, ((0, T - Tl), (0, 0)))

    toks = jnp.concatenate([sfs_p, lfs_p], axis=1).astype(jnp.int32)   # (T, 2B)
    toks = toks.reshape(T * 2 * B, 1)                                   # row t*2B + b
    lens = jnp.concatenate([sf_lens, lf_lens]).astype(jnp.int32)[:, None]  # (2B, 1)

    logp = fused_forward(toks, lens, params["embed"], params["wih_t"],
                         params["whh_t"], params["b_lstm"],
                         params["w_fc_t"], params["b_fc"], T=T, B=B)
    # dropout(p=0.5) is identity in eval mode; module returns (log_softmax, 0).
    return logp, 0


# ----------------------------------------------------------------------------
# Pure-JAX reference (for verification)
# ----------------------------------------------------------------------------
def _lstm_ref(x, lens, wih_t, whh_t, b):
    T, B, _ = x.shape
    H = whh_t.shape[0]

    def step(carry, inp):
        h, c = carry
        x_t, t = inp
        gates = x_t @ wih_t + h @ whh_t + b
        i_g = jax.nn.sigmoid(gates[:, :H])
        f_g = jax.nn.sigmoid(gates[:, H:2 * H])
        g_g = jnp.tanh(gates[:, 2 * H:3 * H])
        o_g = jax.nn.sigmoid(gates[:, 3 * H:])
        c_new = f_g * c + i_g * g_g
        h_new = o_g * jnp.tanh(c_new)
        mask = (lens > t)[:, None]
        return (jnp.where(mask, h_new, h), jnp.where(mask, c_new, c)), None

    init = (jnp.zeros((B, H), jnp.float32), jnp.zeros((B, H), jnp.float32))
    (h, _), _ = lax.scan(step, init, (x, jnp.arange(T)))
    return h


def _forward_ref(params, sfs, lfs, sf_lens, lf_lens):
    sf_emb = jnp.take(params["embed"], sfs, axis=0).astype(jnp.float32)
    lf_emb = jnp.take(params["embed"], lfs, axis=0).astype(jnp.float32)
    sf_h = _lstm_ref(sf_emb, sf_lens, params["wih_t"], params["whh_t"], params["b_lstm"])
    lf_h = _lstm_ref(lf_emb, lf_lens, params["wih_t"], params["whh_t"], params["b_lstm"])
    z = jnp.concatenate([sf_h, lf_h], axis=1) @ params["w_fc_t"] + params["b_fc"]
    return jax.nn.log_softmax(z, axis=1)


# ----------------------------------------------------------------------------
if __name__ == "__main__":
    # Model hyper-parameters (small, consistent with the module's __init__).
    VOCAB = 50          # input_size
    EMBED = 16          # embed_size
    HIDDEN = 32         # hidden_size
    OUT = 8             # output_size
    T = 8               # max sequence length
    B = 2               # batch

    key = jax.random.PRNGKey(0)
    keys = jax.random.split(key, 8)

    # Deterministic parameter init (shapes follow nn.Embedding / nn.LSTM / nn.Linear).
    scale = 1.0 / np.sqrt(HIDDEN)
    params = {
        "embed": jax.random.normal(keys[0], (VOCAB, EMBED), jnp.float32) * 0.1,
        # LSTM: weight_ih (4H, E) -> transposed (E, 4H); weight_hh (4H, H) -> (H, 4H)
        "wih_t": jax.random.uniform(keys[1], (EMBED, 4 * HIDDEN), jnp.float32,
                                    -scale, scale),
        "whh_t": jax.random.uniform(keys[2], (HIDDEN, 4 * HIDDEN), jnp.float32,
                                    -scale, scale),
        # b_ih + b_hh folded into a single bias (1, 4H)
        "b_lstm": jax.random.uniform(keys[3], (1, 4 * HIDDEN), jnp.float32,
                                     -scale, scale),
        # Linear: weight (O, 2H) -> transposed (2H, O); bias (1, O)
        "w_fc_t": jax.random.uniform(keys[4], (2 * HIDDEN, OUT), jnp.float32,
                                     -scale, scale),
        "b_fc": jax.random.uniform(keys[5], (1, OUT), jnp.float32, -scale, scale),
    }

    # Inputs: (T, B) int32 token ids (seq-major), and per-sequence lengths.
    sfs = jax.random.randint(keys[6], (T, B), 0, VOCAB, jnp.int32)
    lfs = jax.random.randint(keys[7], (T, B), 0, VOCAB, jnp.int32)
    sf_lens = jnp.array([8, 5], jnp.int32)
    lf_lens = jnp.array([6, 8], jnp.int32)

    out, _ = toy_embed_rnn_forward(params, sfs, lfs, sf_lens, lf_lens)
    out = jax.block_until_ready(out)

    ref = _forward_ref(params, sfs, lfs, sf_lens, lf_lens)
    ref = jax.block_until_ready(ref)

    np.testing.assert_allclose(np.asarray(out), np.asarray(ref), rtol=2e-2, atol=2e-2)
    assert out.shape == (B, OUT) and out.dtype == jnp.float32

    print("KERNEL_OK")
</pallas_src>

<mosaic_0001>
module attributes {stable_mosaic.version = 11 : i64} {
  func.func @_fused_kernel(%arg0: memref<32x1xi32, #tpu.memory_space<vmem>>, %arg1: memref<4x1xi32, #tpu.memory_space<vmem>>, %arg2: memref<50x16xf32, #tpu.memory_space<vmem>>, %arg3: memref<16x128xf32, #tpu.memory_space<vmem>>, %arg4: memref<32x128xf32, #tpu.memory_space<vmem>>, %arg5: memref<1x128xf32, #tpu.memory_space<vmem>>, %arg6: memref<64x8xf32, #tpu.memory_space<vmem>>, %arg7: memref<1x8xf32, #tpu.memory_space<vmem>>, %arg8: memref<2x8xf32, #tpu.memory_space<vmem>>) attributes {dimension_semantics = [], scalar_prefetch = 0 : i64, scratch_operands = 0 : i64, tpu.core_type = #tpu.core_type<tc>} {
    %c0 = arith.constant 0 : index
    %c0_0 = arith.constant 0 : index
    %0 = vector.load %arg0[%c0, %c0_0] : memref<32x1xi32, #tpu.memory_space<vmem>>, vector<32x1xi32>
    %1 = tpu.iota {dimensions = array<i32: 1>} : vector<32x50xi32>
    %2 = vector.broadcast %0 : vector<32x1xi32> to vector<32x50xi32>
    %3 = arith.cmpi eq, %2, %1 : vector<32x50xi32>
    %4 = arith.extui %3 : vector<32x50xi1> to vector<32x50xi32>
    %5 = arith.sitofp %4 : vector<32x50xi32> to vector<32x50xf32>
    %c0_1 = arith.constant 0 : index
    %c0_2 = arith.constant 0 : index
    %6 = vector.load %arg2[%c0_1, %c0_2] : memref<50x16xf32, #tpu.memory_space<vmem>>, vector<50x16xf32>
    %cst = arith.constant dense<0.000000e+00> : vector<32x16xf32>
    %7 = tpu.matmul %5, %6, %cst {dimension_numbers = #tpu.dot_dimension_numbers<[1], [0], [0], [1], [0, 0, 1, 1], [], []>} : vector<32x50xf32>, vector<50x16xf32>, vector<32x16xf32> -> vector<32x16xf32>
    %c0_3 = arith.constant 0 : index
    %c0_4 = arith.constant 0 : index
    %8 = vector.load %arg3[%c0_3, %c0_4] : memref<16x128xf32, #tpu.memory_space<vmem>>, vector<16x128xf32>
    %cst_5 = arith.constant dense<0.000000e+00> : vector<32x128xf32>
    %9 = tpu.matmul %7, %8, %cst_5 {dimension_numbers = #tpu.dot_dimension_numbers<[1], [0], [0], [1], [0, 0, 1, 1], [], []>} : vector<32x16xf32>, vector<16x128xf32>, vector<32x128xf32> -> vector<32x128xf32>
    %c0_6 = arith.constant 0 : index
    %c0_7 = arith.constant 0 : index
    %10 = vector.load %arg5[%c0_6, %c0_7] : memref<1x128xf32, #tpu.memory_space<vmem>>, vector<1x128xf32>
    %11 = vector.broadcast %10 : vector<1x128xf32> to vector<32x128xf32>
    %12 = arith.addf %9, %11 : vector<32x128xf32>
    %c0_8 = arith.constant 0 : index
    %c0_9 = arith.constant 0 : index
    %13 = vector.load %arg1[%c0_8, %c0_9] : memref<4x1xi32, #tpu.memory_space<vmem>>, vector<4x1xi32>
    %cst_10 = arith.constant 0.000000e+00 : f32
    %14 = vector.broadcast %cst_10 : f32 to vector<4x32xf32>
    %cst_11 = arith.constant 0.000000e+00 : f32
    %15 = vector.broadcast %cst_11 : f32 to vector<4x32xf32>
    %16 = vector.extract_strided_slice %12 {offsets = [0, 0], sizes = [4, 128], strides = [1, 1]} : vector<32x128xf32> to vector<4x128xf32>
    %c0_12 = arith.constant 0 : index
    %c0_13 = arith.constant 0 : index
    %17 = vector.load %arg4[%c0_12, %c0_13] : memref<32x128xf32, #tpu.memory_space<vmem>>, vector<32x128xf32>
    %cst_14 = arith.constant dense<0.000000e+00> : vector<4x128xf32>
    %18 = tpu.matmul %14, %17, %cst_14 {dimension_numbers = #tpu.dot_dimension_numbers<[1], [0], [0], [1], [0, 0, 1, 1], [], []>} : vector<4x32xf32>, vector<32x128xf32>, vector<4x128xf32> -> vector<4x128xf32>
    %19 = arith.addf %16, %18 : vector<4x128xf32>
    %20 = vector.extract_strided_slice %19 {offsets = [0, 0], sizes = [4, 32], strides = [1, 1]} : vector<4x128xf32> to vector<4x32xf32>
    %21 = arith.negf %20 : vector<4x32xf32>
    %22 = math.exp %21 : vector<4x32xf32>
    %cst_15 = arith.constant 1.000000e+00 : f32
    %23 = vector.broadcast %cst_15 : f32 to vector<4x32xf32>
    %24 = arith.addf %23, %22 : vector<4x32xf32>
    %25 = arith.divf %23, %24 : vector<4x32xf32>
    %26 = vector.extract_strided_slice %19 {offsets = [0, 32], sizes = [4, 32], strides = [1, 1]} : vector<4x128xf32> to vector<4x32xf32>
    %27 = arith.negf %26 : vector<4x32xf32>
    %28 = math.exp %27 : vector<4x32xf32>
    %cst_16 = arith.constant 1.000000e+00 : f32
    %29 = vector.broadcast %cst_16 : f32 to vector<4x32xf32>
    %30 = arith.addf %29, %28 : vector<4x32xf32>
    %31 = arith.divf %29, %30 : vector<4x32xf32>
    %32 = vector.extract_strided_slice %19 {offsets = [0, 64], sizes = [4, 32], strides = [1, 1]} : vector<4x128xf32> to vector<4x32xf32>
    %33 = math.tanh %32 : vector<4x32xf32>
    %34 = vector.extract_strided_slice %19 {offsets = [0, 96], sizes = [4, 32], strides = [1, 1]} : vector<4x128xf32> to vector<4x32xf32>
    %35 = arith.negf %34 : vector<4x32xf32>
    %36 = math.exp %35 : vector<4x32xf32>
    %cst_17 = arith.constant 1.000000e+00 : f32
    %37 = vector.broadcast %cst_17 : f32 to vector<4x32xf32>
    %38 = arith.addf %37, %36 : vector<4x32xf32>
    %39 = arith.divf %37, %38 : vector<4x32xf32>
    %40 = arith.mulf %31, %15 : vector<4x32xf32>
    %41 = arith.mulf %25, %33 : vector<4x32xf32>
    %42 = arith.addf %40, %41 : vector<4x32xf32>
    %43 = math.tanh %42 : vector<4x32xf32>
    %44 = arith.mulf %39, %43 : vector<4x32xf32>
    %c0_i32 = arith.constant 0 : i32
    %45 = vector.broadcast %c0_i32 : i32 to vector<4x1xi32>
    %46 = arith.cmpi sgt, %13, %45 : vector<4x1xi32>
    %47 = vector.shape_cast %46 : vector<4x1xi1> to vector<4x1xi1>
    %48 = vector.broadcast %47 : vector<4x1xi1> to vector<4x32xi1>
    %49 = arith.select %48, %44, %14 : vector<4x32xi1>, vector<4x32xf32>
    %50 = vector.shape_cast %46 : vector<4x1xi1> to vector<4x1xi1>
    %51 = vector.broadcast %50 : vector<4x1xi1> to vector<4x32xi1>
    %52 = arith.select %51, %42, %15 : vector<4x32xi1>, vector<4x32xf32>
    %53 = vector.extract_strided_slice %12 {offsets = [4, 0], sizes = [4, 128], strides = [1, 1]} : vector<32x128xf32> to vector<4x128xf32>
    %c0_18 = arith.constant 0 : index
    %c0_19 = arith.constant 0 : index
    %54 = vector.load %arg4[%c0_18, %c0_19] : memref<32x128xf32, #tpu.memory_space<vmem>>, vector<32x128xf32>
    %cst_20 = arith.constant dense<0.000000e+00> : vector<4x128xf32>
    %55 = tpu.matmul %49, %54, %cst_20 {dimension_numbers = #tpu.dot_dimension_numbers<[1], [0], [0], [1], [0, 0, 1, 1], [], []>} : vector<4x32xf32>, vector<32x128xf32>, vector<4x128xf32> -> vector<4x128xf32>
    %56 = arith.addf %53, %55 : vector<4x128xf32>
    %57 = vector.extract_strided_slice %56 {offsets = [0, 0], sizes = [4, 32], strides = [1, 1]} : vector<4x128xf32> to vector<4x32xf32>
    %58 = arith.negf %57 : vector<4x32xf32>
    %59 = math.exp %58 : vector<4x32xf32>
    %cst_21 = arith.constant 1.000000e+00 : f32
    %60 = vector.broadcast %cst_21 : f32 to vector<4x32xf32>
    %61 = arith.addf %60, %59 : vector<4x32xf32>
    %62 = arith.divf %60, %61 : vector<4x32xf32>
    %63 = vector.extract_strided_slice %56 {offsets = [0, 32], sizes = [4, 32], strides = [1, 1]} : vector<4x128xf32> to vector<4x32xf32>
    %64 = arith.negf %63 : vector<4x32xf32>
    %65 = math.exp %64 : vector<4x32xf32>
    %cst_22 = arith.constant 1.000000e+00 : f32
    %66 = vector.broadcast %cst_22 : f32 to vector<4x32xf32>
    %67 = arith.addf %66, %65 : vector<4x32xf32>
    %68 = arith.divf %66, %67 : vector<4x32xf32>
    %69 = vector.extract_strided_slice %56 {offsets = [0, 64], sizes = [4, 32], strides = [1, 1]} : vector<4x128xf32> to vector<4x32xf32>
    %70 = math.tanh %69 : vector<4x32xf32>
    %71 = vector.extract_strided_slice %56 {offsets = [0, 96], sizes = [4, 32], strides = [1, 1]} : vector<4x128xf32> to vector<4x32xf32>
    %72 = arith.negf %71 : vector<4x32xf32>
    %73 = math.exp %72 : vector<4x32xf32>
    %cst_23 = arith.constant 1.000000e+00 : f32
    %74 = vector.broadcast %cst_23 : f32 to vector<4x32xf32>
    %75 = arith.addf %74, %73 : vector<4x32xf32>
    %76 = arith.divf %74, %75 : vector<4x32xf32>
    %77 = arith.mulf %68, %52 : vector<4x32xf32>
    %78 = arith.mulf %62, %70 : vector<4x32xf32>
    %79 = arith.addf %77, %78 : vector<4x32xf32>
    %80 = math.tanh %79 : vector<4x32xf32>
    %81 = arith.mulf %76, %80 : vector<4x32xf32>
    %c1_i32 = arith.constant 1 : i32
    %82 = vector.broadcast %c1_i32 : i32 to vector<4x1xi32>
    %83 = arith.cmpi sgt, %13, %82 : vector<4x1xi32>
    %84 = vector.shape_cast %83 : vector<4x1xi1> to vector<4x1xi1>
    %85 = vector.broadcast %84 : vector<4x1xi1> to vector<4x32xi1>
    %86 = arith.select %85, %81, %49 : vector<4x32xi1>, vector<4x32xf32>
    %87 = vector.shape_cast %83 : vector<4x1xi1> to vector<4x1xi1>
    %88 = vector.broadcast %87 : vector<4x1xi1> to vector<4x32xi1>
    %89 = arith.select %88, %79, %52 : vector<4x32xi1>, vector<4x32xf32>
    %90 = vector.extract_strided_slice %12 {offsets = [8, 0], sizes = [4, 128], strides = [1, 1]} : vector<32x128xf32> to vector<4x128xf32>
    %c0_24 = arith.constant 0 : index
    %c0_25 = arith.constant 0 : index
    %91 = vector.load %arg4[%c0_24, %c0_25] : memref<32x128xf32, #tpu.memory_space<vmem>>, vector<32x128xf32>
    %cst_26 = arith.constant dense<0.000000e+00> : vector<4x128xf32>
    %92 = tpu.matmul %86, %91, %cst_26 {dimension_numbers = #tpu.dot_dimension_numbers<[1], [0], [0], [1], [0, 0, 1, 1], [], []>} : vector<4x32xf32>, vector<32x128xf32>, vector<4x128xf32> -> vector<4x128xf32>
    %93 = arith.addf %90, %92 : vector<4x128xf32>
    %94 = vector.extract_strided_slice %93 {offsets = [0, 0], sizes = [4, 32], strides = [1, 1]} : vector<4x128xf32> to vector<4x32xf32>
    %95 = arith.negf %94 : vector<4x32xf32>
    %96 = math.exp %95 : vector<4x32xf32>
    %cst_27 = arith.constant 1.000000e+00 : f32
    %97 = vector.broadcast %cst_27 : f32 to vector<4x32xf32>
    %98 = arith.addf %97, %96 : vector<4x32xf32>
    %99 = arith.divf %97, %98 : vector<4x32xf32>
    %100 = vector.extract_strided_slice %93 {offsets = [0, 32], sizes = [4, 32], strides = [1, 1]} : vector<4x128xf32> to vector<4x32xf32>
    %101 = arith.negf %100 : vector<4x32xf32>
    %102 = math.exp %101 : vector<4x32xf32>
    %cst_28 = arith.constant 1.000000e+00 : f32
    %103 = vector.broadcast %cst_28 : f32 to vector<4x32xf32>
    %104 = arith.addf %103, %102 : vector<4x32xf32>
    %105 = arith.divf %103, %104 : vector<4x32xf32>
    %106 = vector.extract_strided_slice %93 {offsets = [0, 64], sizes = [4, 32], strides = [1, 1]} : vector<4x128xf32> to vector<4x32xf32>
    %107 = math.tanh %106 : vector<4x32xf32>
    %108 = vector.extract_strided_slice %93 {offsets = [0, 96], sizes = [4, 32], strides = [1, 1]} : vector<4x128xf32> to vector<4x32xf32>
    %109 = arith.negf %108 : vector<4x32xf32>
    %110 = math.exp %109 : vector<4x32xf32>
    %cst_29 = arith.constant 1.000000e+00 : f32
    %111 = vector.broadcast %cst_29 : f32 to vector<4x32xf32>
    %112 = arith.addf %111, %110 : vector<4x32xf32>
    %113 = arith.divf %111, %112 : vector<4x32xf32>
    %114 = arith.mulf %105, %89 : vector<4x32xf32>
    %115 = arith.mulf %99, %107 : vector<4x32xf32>
    %116 = arith.addf %114, %115 : vector<4x32xf32>
    %117 = math.tanh %116 : vector<4x32xf32>
    %118 = arith.mulf %113, %117 : vector<4x32xf32>
    %c2_i32 = arith.constant 2 : i32
    %119 = vector.broadcast %c2_i32 : i32 to vector<4x1xi32>
    %120 = arith.cmpi sgt, %13, %119 : vector<4x1xi32>
    %121 = vector.shape_cast %120 : vector<4x1xi1> to vector<4x1xi1>
    %122 = vector.broadcast %121 : vector<4x1xi1> to vector<4x32xi1>
    %123 = arith.select %122, %118, %86 : vector<4x32xi1>, vector<4x32xf32>
    %124 = vector.shape_cast %120 : vector<4x1xi1> to vector<4x1xi1>
    %125 = vector.broadcast %124 : vector<4x1xi1> to vector<4x32xi1>
    %126 = arith.select %125, %116, %89 : vector<4x32xi1>, vector<4x32xf32>
    %127 = vector.extract_strided_slice %12 {offsets = [12, 0], sizes = [4, 128], strides = [1, 1]} : vector<32x128xf32> to vector<4x128xf32>
    %c0_30 = arith.constant 0 : index
    %c0_31 = arith.constant 0 : index
    %128 = vector.load %arg4[%c0_30, %c0_31] : memref<32x128xf32, #tpu.memory_space<vmem>>, vector<32x128xf32>
    %cst_32 = arith.constant dense<0.000000e+00> : vector<4x128xf32>
    %129 = tpu.matmul %123, %128, %cst_32 {dimension_numbers = #tpu.dot_dimension_numbers<[1], [0], [0], [1], [0, 0, 1, 1], [], []>} : vector<4x32xf32>, vector<32x128xf32>, vector<4x128xf32> -> vector<4x128xf32>
    %130 = arith.addf %127, %129 : vector<4x128xf32>
    %131 = vector.extract_strided_slice %130 {offsets = [0, 0], sizes = [4, 32], strides = [1, 1]} : vector<4x128xf32> to vector<4x32xf32>
    %132 = arith.negf %131 : vector<4x32xf32>
    %133 = math.exp %132 : vector<4x32xf32>
    %cst_33 = arith.constant 1.000000e+00 : f32
    %134 = vector.broadcast %cst_33 : f32 to vector<4x32xf32>
    %135 = arith.addf %134, %133 : vector<4x32xf32>
    %136 = arith.divf %134, %135 : vector<4x32xf32>
    %137 = vector.extract_strided_slice %130 {offsets = [0, 32], sizes = [4, 32], strides = [1, 1]} : vector<4x128xf32> to vector<4x32xf32>
    %138 = arith.negf %137 : vector<4x32xf32>
    %139 = math.exp %138 : vector<4x32xf32>
    %cst_34 = arith.constant 1.000000e+00 : f32
    %140 = vector.broadcast %cst_34 : f32 to vector<4x32xf32>
    %141 = arith.addf %140, %139 : vector<4x32xf32>
    %142 = arith.divf %140, %141 : vector<4x32xf32>
    %143 = vector.extract_strided_slice %130 {offsets = [0, 64], sizes = [4, 32], strides = [1, 1]} : vector<4x128xf32> to vector<4x32xf32>
    %144 = math.tanh %143 : vector<4x32xf32>
    %145 = vector.extract_strided_slice %130 {offsets = [0, 96], sizes = [4, 32], strides = [1, 1]} : vector<4x128xf32> to vector<4x32xf32>
    %146 = arith.negf %145 : vector<4x32xf32>
    %147 = math.exp %146 : vector<4x32xf32>
    %cst_35 = arith.constant 1.000000e+00 : f32
    %148 = vector.broadcast %cst_35 : f32 to vector<4x32xf32>
    %149 = arith.addf %148, %147 : vector<4x32xf32>
    %150 = arith.divf %148, %149 : vector<4x32xf32>
    %151 = arith.mulf %142, %126 : vector<4x32xf32>
    %152 = arith.mulf %136, %144 : vector<4x32xf32>
    %153 = arith.addf %151, %152 : vector<4x32xf32>
    %154 = math.tanh %153 : vector<4x32xf32>
    %155 = arith.mulf %150, %154 : vector<4x32xf32>
    %c3_i32 = arith.constant 3 : i32
    %156 = vector.broadcast %c3_i32 : i32 to vector<4x1xi32>
    %157 = arith.cmpi sgt, %13, %156 : vector<4x1xi32>
    %158 = vector.shape_cast %157 : vector<4x1xi1> to vector<4x1xi1>
    %159 = vector.broadcast %158 : vector<4x1xi1> to vector<4x32xi1>
    %160 = arith.select %159, %155, %123 : vector<4x32xi1>, vector<4x32xf32>
    %161 = vector.shape_cast %157 : vector<4x1xi1> to vector<4x1xi1>
    %162 = vector.broadcast %161 : vector<4x1xi1> to vector<4x32xi1>
    %163 = arith.select %162, %153, %126 : vector<4x32xi1>, vector<4x32xf32>
    %164 = vector.extract_strided_slice %12 {offsets = [16, 0], sizes = [4, 128], strides = [1, 1]} : vector<32x128xf32> to vector<4x128xf32>
    %c0_36 = arith.constant 0 : index
    %c0_37 = arith.constant 0 : index
    %165 = vector.load %arg4[%c0_36, %c0_37] : memref<32x128xf32, #tpu.memory_space<vmem>>, vector<32x128xf32>
    %cst_38 = arith.constant dense<0.000000e+00> : vector<4x128xf32>
    %166 = tpu.matmul %160, %165, %cst_38 {dimension_numbers = #tpu.dot_dimension_numbers<[1], [0], [0], [1], [0, 0, 1, 1], [], []>} : vector<4x32xf32>, vector<32x128xf32>, vector<4x128xf32> -> vector<4x128xf32>
    %167 = arith.addf %164, %166 : vector<4x128xf32>
    %168 = vector.extract_strided_slice %167 {offsets = [0, 0], sizes = [4, 32], strides = [1, 1]} : vector<4x128xf32> to vector<4x32xf32>
    %169 = arith.negf %168 : vector<4x32xf32>
    %170 = math.exp %169 : vector<4x32xf32>
    %cst_39 = arith.constant 1.000000e+00 : f32
    %171 = vector.broadcast %cst_39 : f32 to vector<4x32xf32>
    %172 = arith.addf %171, %170 : vector<4x32xf32>
    %173 = arith.divf %171, %172 : vector<4x32xf32>
    %174 = vector.extract_strided_slice %167 {offsets = [0, 32], sizes = [4, 32], strides = [1, 1]} : vector<4x128xf32> to vector<4x32xf32>
    %175 = arith.negf %174 : vector<4x32xf32>
    %176 = math.exp %175 : vector<4x32xf32>
    %cst_40 = arith.constant 1.000000e+00 : f32
    %177 = vector.broadcast %cst_40 : f32 to vector<4x32xf32>
    %178 = arith.addf %177, %176 : vector<4x32xf32>
    %179 = arith.divf %177, %178 : vector<4x32xf32>
    %180 = vector.extract_strided_slice %167 {offsets = [0, 64], sizes = [4, 32], strides = [1, 1]} : vector<4x128xf32> to vector<4x32xf32>
    %181 = math.tanh %180 : vector<4x32xf32>
    %182 = vector.extract_strided_slice %167 {offsets = [0, 96], sizes = [4, 32], strides = [1, 1]} : vector<4x128xf32> to vector<4x32xf32>
    %183 = arith.negf %182 : vector<4x32xf32>
    %184 = math.exp %183 : vector<4x32xf32>
    %cst_41 = arith.constant 1.000000e+00 : f32
    %185 = vector.broadcast %cst_41 : f32 to vector<4x32xf32>
    %186 = arith.addf %185, %184 : vector<4x32xf32>
    %187 = arith.divf %185, %186 : vector<4x32xf32>
    %188 = arith.mulf %179, %163 : vector<4x32xf32>
    %189 = arith.mulf %173, %181 : vector<4x32xf32>
    %190 = arith.addf %188, %189 : vector<4x32xf32>
    %191 = math.tanh %190 : vector<4x32xf32>
    %192 = arith.mulf %187, %191 : vector<4x32xf32>
    %c4_i32 = arith.constant 4 : i32
    %193 = vector.broadcast %c4_i32 : i32 to vector<4x1xi32>
    %194 = arith.cmpi sgt, %13, %193 : vector<4x1xi32>
    %195 = vector.shape_cast %194 : vector<4x1xi1> to vector<4x1xi1>
    %196 = vector.broadcast %195 : vector<4x1xi1> to vector<4x32xi1>
    %197 = arith.select %196, %192, %160 : vector<4x32xi1>, vector<4x32xf32>
    %198 = vector.shape_cast %194 : vector<4x1xi1> to vector<4x1xi1>
    %199 = vector.broadcast %198 : vector<4x1xi1> to vector<4x32xi1>
    %200 = arith.select %199, %190, %163 : vector<4x32xi1>, vector<4x32xf32>
    %201 = vector.extract_strided_slice %12 {offsets = [20, 0], sizes = [4, 128], strides = [1, 1]} : vector<32x128xf32> to vector<4x128xf32>
    %c0_42 = arith.constant 0 : index
    %c0_43 = arith.constant 0 : index
    %202 = vector.load %arg4[%c0_42, %c0_43] : memref<32x128xf32, #tpu.memory_space<vmem>>, vector<32x128xf32>
    %cst_44 = arith.constant dense<0.000000e+00> : vector<4x128xf32>
    %203 = tpu.matmul %197, %202, %cst_44 {dimension_numbers = #tpu.dot_dimension_numbers<[1], [0], [0], [1], [0, 0, 1, 1], [], []>} : vector<4x32xf32>, vector<32x128xf32>, vector<4x128xf32> -> vector<4x128xf32>
    %204 = arith.addf %201, %203 : vector<4x128xf32>
    %205 = vector.extract_strided_slice %204 {offsets = [0, 0], sizes = [4, 32], strides = [1, 1]} : vector<4x128xf32> to vector<4x32xf32>
    %206 = arith.negf %205 : vector<4x32xf32>
    %207 = math.exp %206 : vector<4x32xf32>
    %cst_45 = arith.constant 1.000000e+00 : f32
    %208 = vector.broadcast %cst_45 : f32 to vector<4x32xf32>
    %209 = arith.addf %208, %207 : vector<4x32xf32>
    %210 = arith.divf %208, %209 : vector<4x32xf32>
    %211 = vector.extract_strided_slice %204 {offsets = [0, 32], sizes = [4, 32], strides = [1, 1]} : vector<4x128xf32> to vector<4x32xf32>
    %212 = arith.negf %211 : vector<4x32xf32>
    %213 = math.exp %212 : vector<4x32xf32>
    %cst_46 = arith.constant 1.000000e+00 : f32
    %214 = vector.broadcast %cst_46 : f32 to vector<4x32xf32>
    %215 = arith.addf %214, %213 : vector<4x32xf32>
    %216 = arith.divf %214, %215 : vector<4x32xf32>
    %217 = vector.extract_strided_slice %204 {offsets = [0, 64], sizes = [4, 32], strides = [1, 1]} : vector<4x128xf32> to vector<4x32xf32>
    %218 = math.tanh %217 : vector<4x32xf32>
    %219 = vector.extract_strided_slice %204 {offsets = [0, 96], sizes = [4, 32], strides = [1, 1]} : vector<4x128xf32> to vector<4x32xf32>
    %220 = arith.negf %219 : vector<4x32xf32>
    %221 = math.exp %220 : vector<4x32xf32>
    %cst_47 = arith.constant 1.000000e+00 : f32
    %222 = vector.broadcast %cst_47 : f32 to vector<4x32xf32>
    %223 = arith.addf %222, %221 : vector<4x32xf32>
    %224 = arith.divf %222, %223 : vector<4x32xf32>
    %225 = arith.mulf %216, %200 : vector<4x32xf32>
    %226 = arith.mulf %210, %218 : vector<4x32xf32>
    %227 = arith.addf %225, %226 : vector<4x32xf32>
    %228 = math.tanh %227 : vector<4x32xf32>
    %229 = arith.mulf %224, %228 : vector<4x32xf32>
    %c5_i32 = arith.constant 5 : i32
    %230 = vector.broadcast %c5_i32 : i32 to vector<4x1xi32>
    %231 = arith.cmpi sgt, %13, %230 : vector<4x1xi32>
    %232 = vector.shape_cast %231 : vector<4x1xi1> to vector<4x1xi1>
    %233 = vector.broadcast %232 : vector<4x1xi1> to vector<4x32xi1>
    %234 = arith.select %233, %229, %197 : vector<4x32xi1>, vector<4x32xf32>
    %235 = vector.shape_cast %231 : vector<4x1xi1> to vector<4x1xi1>
    %236 = vector.broadcast %235 : vector<4x1xi1> to vector<4x32xi1>
    %237 = arith.select %236, %227, %200 : vector<4x32xi1>, vector<4x32xf32>
    %238 = vector.extract_strided_slice %12 {offsets = [24, 0], sizes = [4, 128], strides = [1, 1]} : vector<32x128xf32> to vector<4x128xf32>
    %c0_48 = arith.constant 0 : index
    %c0_49 = arith.constant 0 : index
    %239 = vector.load %arg4[%c0_48, %c0_49] : memref<32x128xf32, #tpu.memory_space<vmem>>, vector<32x128xf32>
    %cst_50 = arith.constant dense<0.000000e+00> : vector<4x128xf32>
    %240 = tpu.matmul %234, %239, %cst_50 {dimension_numbers = #tpu.dot_dimension_numbers<[1], [0], [0], [1], [0, 0, 1, 1], [], []>} : vector<4x32xf32>, vector<32x128xf32>, vector<4x128xf32> -> vector<4x128xf32>
    %241 = arith.addf %238, %240 : vector<4x128xf32>
    %242 = vector.extract_strided_slice %241 {offsets = [0, 0], sizes = [4, 32], strides = [1, 1]} : vector<4x128xf32> to vector<4x32xf32>
    %243 = arith.negf %242 : vector<4x32xf32>
    %244 = math.exp %243 : vector<4x32xf32>
    %cst_51 = arith.constant 1.000000e+00 : f32
    %245 = vector.broadcast %cst_51 : f32 to vector<4x32xf32>
    %246 = arith.addf %245, %244 : vector<4x32xf32>
    %247 = arith.divf %245, %246 : vector<4x32xf32>
    %248 = vector.extract_strided_slice %241 {offsets = [0, 32], sizes = [4, 32], strides = [1, 1]} : vector<4x128xf32> to vector<4x32xf32>
    %249 = arith.negf %248 : vector<4x32xf32>
    %250 = math.exp %249 : vector<4x32xf32>
    %cst_52 = arith.constant 1.000000e+00 : f32
    %251 = vector.broadcast %cst_52 : f32 to vector<4x32xf32>
    %252 = arith.addf %251, %250 : vector<4x32xf32>
    %253 = arith.divf %251, %252 : vector<4x32xf32>
    %254 = vector.extract_strided_slice %241 {offsets = [0, 64], sizes = [4, 32], strides = [1, 1]} : vector<4x128xf32> to vector<4x32xf32>
    %255 = math.tanh %254 : vector<4x32xf32>
    %256 = vector.extract_strided_slice %241 {offsets = [0, 96], sizes = [4, 32], strides = [1, 1]} : vector<4x128xf32> to vector<4x32xf32>
    %257 = arith.negf %256 : vector<4x32xf32>
    %258 = math.exp %257 : vector<4x32xf32>
    %cst_53 = arith.constant 1.000000e+00 : f32
    %259 = vector.broadcast %cst_53 : f32 to vector<4x32xf32>
    %260 = arith.addf %259, %258 : vector<4x32xf32>
    %261 = arith.divf %259, %260 : vector<4x32xf32>
    %262 = arith.mulf %253, %237 : vector<4x32xf32>
    %263 = arith.mulf %247, %255 : vector<4x32xf32>
    %264 = arith.addf %262, %263 : vector<4x32xf32>
    %265 = math.tanh %264 : vector<4x32xf32>
    %266 = arith.mulf %261, %265 : vector<4x32xf32>
    %c6_i32 = arith.constant 6 : i32
    %267 = vector.broadcast %c6_i32 : i32 to vector<4x1xi32>
    %268 = arith.cmpi sgt, %13, %267 : vector<4x1xi32>
    %269 = vector.shape_cast %268 : vector<4x1xi1> to vector<4x1xi1>
    %270 = vector.broadcast %269 : vector<4x1xi1> to vector<4x32xi1>
    %271 = arith.select %270, %266, %234 : vector<4x32xi1>, vector<4x32xf32>
    %272 = vector.shape_cast %268 : vector<4x1xi1> to vector<4x1xi1>
    %273 = vector.broadcast %272 : vector<4x1xi1> to vector<4x32xi1>
    %274 = arith.select %273, %264, %237 : vector<4x32xi1>, vector<4x32xf32>
    %275 = vector.extract_strided_slice %12 {offsets = [28, 0], sizes = [4, 128], strides = [1, 1]} : vector<32x128xf32> to vector<4x128xf32>
    %c0_54 = arith.constant 0 : index
    %c0_55 = arith.constant 0 : index
    %276 = vector.load %arg4[%c0_54, %c0_55] : memref<32x128xf32, #tpu.memory_space<vmem>>, vector<32x128xf32>
    %cst_56 = arith.constant dense<0.000000e+00> : vector<4x128xf32>
    %277 = tpu.matmul %271, %276, %cst_56 {dimension_numbers = #tpu.dot_dimension_numbers<[1], [0], [0], [1], [0, 0, 1, 1], [], []>} : vector<4x32xf32>, vector<32x128xf32>, vector<4x128xf32> -> vector<4x128xf32>
    %278 = arith.addf %275, %277 : vector<4x128xf32>
    %279 = vector.extract_strided_slice %278 {offsets = [0, 0], sizes = [4, 32], strides = [1, 1]} : vector<4x128xf32> to vector<4x32xf32>
    %280 = arith.negf %279 : vector<4x32xf32>
    %281 = math.exp %280 : vector<4x32xf32>
    %cst_57 = arith.constant 1.000000e+00 : f32
    %282 = vector.broadcast %cst_57 : f32 to vector<4x32xf32>
    %283 = arith.addf %282, %281 : vector<4x32xf32>
    %284 = arith.divf %282, %283 : vector<4x32xf32>
    %285 = vector.extract_strided_slice %278 {offsets = [0, 32], sizes = [4, 32], strides = [1, 1]} : vector<4x128xf32> to vector<4x32xf32>
    %286 = arith.negf %285 : vector<4x32xf32>
    %287 = math.exp %286 : vector<4x32xf32>
    %cst_58 = arith.constant 1.000000e+00 : f32
    %288 = vector.broadcast %cst_58 : f32 to vector<4x32xf32>
    %289 = arith.addf %288, %287 : vector<4x32xf32>
    %290 = arith.divf %288, %289 : vector<4x32xf32>
    %291 = vector.extract_strided_slice %278 {offsets = [0, 64], sizes = [4, 32], strides = [1, 1]} : vector<4x128xf32> to vector<4x32xf32>
    %292 = math.tanh %291 : vector<4x32xf32>
    %293 = vector.extract_strided_slice %278 {offsets = [0, 96], sizes = [4, 32], strides = [1, 1]} : vector<4x128xf32> to vector<4x32xf32>
    %294 = arith.negf %293 : vector<4x32xf32>
    %295 = math.exp %294 : vector<4x32xf32>
    %cst_59 = arith.constant 1.000000e+00 : f32
    %296 = vector.broadcast %cst_59 : f32 to vector<4x32xf32>
    %297 = arith.addf %296, %295 : vector<4x32xf32>
    %298 = arith.divf %296, %297 : vector<4x32xf32>
    %299 = arith.mulf %290, %274 : vector<4x32xf32>
    %300 = arith.mulf %284, %292 : vector<4x32xf32>
    %301 = arith.addf %299, %300 : vector<4x32xf32>
    %302 = math.tanh %301 : vector<4x32xf32>
    %303 = arith.mulf %298, %302 : vector<4x32xf32>
    %c7_i32 = arith.constant 7 : i32
    %304 = vector.broadcast %c7_i32 : i32 to vector<4x1xi32>
    %305 = arith.cmpi sgt, %13, %304 : vector<4x1xi32>
    %306 = vector.shape_cast %305 : vector<4x1xi1> to vector<4x1xi1>
    %307 = vector.broadcast %306 : vector<4x1xi1> to vector<4x32xi1>
    %308 = arith.select %307, %303, %271 : vector<4x32xi1>, vector<4x32xf32>
    %c0_60 = arith.constant 0 : index
    %c0_61 = arith.constant 0 : index
    %309 = vector.load %arg6[%c0_60, %c0_61] : memref<64x8xf32, #tpu.memory_space<vmem>>, vector<64x8xf32>
    %310 = vector.extract_strided_slice %308 {offsets = [0, 0], sizes = [2, 32], strides = [1, 1]} : vector<4x32xf32> to vector<2x32xf32>
    %311 = vector.extract_strided_slice %309 {offsets = [0, 0], sizes = [32, 8], strides = [1, 1]} : vector<64x8xf32> to vector<32x8xf32>
    %cst_62 = arith.constant dense<0.000000e+00> : vector<2x8xf32>
    %312 = tpu.matmul %310, %311, %cst_62 {dimension_numbers = #tpu.dot_dimension_numbers<[1], [0], [0], [1], [0, 0, 1, 1], [], []>} : vector<2x32xf32>, vector<32x8xf32>, vector<2x8xf32> -> vector<2x8xf32>
    %313 = vector.extract_strided_slice %308 {offsets = [2, 0], sizes = [2, 32], strides = [1, 1]} : vector<4x32xf32> to vector<2x32xf32>
    %314 = vector.extract_strided_slice %309 {offsets = [32, 0], sizes = [32, 8], strides = [1, 1]} : vector<64x8xf32> to vector<32x8xf32>
    %cst_63 = arith.constant dense<0.000000e+00> : vector<2x8xf32>
    %315 = tpu.matmul %313, %314, %cst_63 {dimension_numbers = #tpu.dot_dimension_numbers<[1], [0], [0], [1], [0, 0, 1, 1], [], []>} : vector<2x32xf32>, vector<32x8xf32>, vector<2x8xf32> -> vector<2x8xf32>
    %316 = arith.addf %312, %315 : vector<2x8xf32>
    %c0_64 = arith.constant 0 : index
    %c0_65 = arith.constant 0 : index
    %317 = vector.load %arg7[%c0_64, %c0_65] : memref<1x8xf32, #tpu.memory_space<vmem>>, vector<1x8xf32>
    %318 = vector.broadcast %317 : vector<1x8xf32> to vector<2x8xf32>
    %319 = arith.addf %316, %318 : vector<2x8xf32>
    %cst_66 = arith.constant dense<0xFF800000> : vector<2xf32>
    %320 = vector.multi_reduction <maximumf>, %319, %cst_66 [1] : vector<2x8xf32> to vector<2xf32>
    %321 = vector.shape_cast %320 : vector<2xf32> to vector<2x1xf32>
    %322 = vector.broadcast %321 : vector<2x1xf32> to vector<2x8xf32>
    %323 = arith.subf %319, %322 : vector<2x8xf32>
    %324 = math.exp %323 : vector<2x8xf32>
    %cst_67 = arith.constant dense<0.000000e+00> : vector<2xf32>
    %325 = vector.multi_reduction <add>, %324, %cst_67 [1] : vector<2x8xf32> to vector<2xf32>
    %326 = vector.shape_cast %325 : vector<2xf32> to vector<2x1xf32>
    %327 = math.log %326 : vector<2x1xf32>
    %328 = arith.addf %321, %327 : vector<2x1xf32>
    %329 = vector.broadcast %328 : vector<2x1xf32> to vector<2x8xf32>
    %330 = arith.subf %319, %329 : vector<2x8xf32>
    %c0_68 = arith.constant 0 : index
    %c0_69 = arith.constant 0 : index
    %331 = vector.load %arg8[%c0_68, %c0_69] : memref<2x8xf32, #tpu.memory_space<vmem>>, vector<2x8xf32>
    tpu.vector_store %arg8[%c0_68, %c0_69], %330 {strides = array<i32>} : memref<2x8xf32, #tpu.memory_space<vmem>>, vector<2x8xf32>,
    return
  }
}

</mosaic_0001>

<bundles_post_ra>
// kernel: toy_embed_rnn_forward.1
= control target key start
LH: loop header
LB: loop body
LE: loop exit
PB: predicated region body
PF: predicated region fallthrough
CT: control target
= control target key end

     0   :  { %vm80_vm0 = vcmask 1041408   ;;  %v1759_v2 = vmov 0   ;;  %s2099_s0 = inlined_call_operand.vmem [shape: s32[32,1], index: 0, kind: input, shape index: {}]   ;;  %s2100_s1 = inlined_call_operand.vmem [shape: s32[4,1], index: 1, kind: input, shape index: {}]   ;;  %s2101_s2 = inlined_call_operand.vmem [shape: f32[50,16], index: 2, kind: input, shape index: {}]   ;;  %s2102_s3 = inlined_call_operand.vmem [shape: f32[16,128], index: 3, kind: input, shape index: {}]   ;;  %s2103_s4 = inlined_call_operand.vmem [shape: f32[32,128], index: 4, kind: input, shape index: {}]   ;;  %s2104_s5 = inlined_call_operand.vmem [shape: f32[1,128], index: 5, kind: input, shape index: {}]   ;;  %s2105_s6 = inlined_call_operand.vmem [shape: f32[64,8], index: 6, kind: input, shape index: {}]   ;;  %s2106_s7 = inlined_call_operand.vmem [shape: f32[1,8], index: 7, kind: input, shape index: {}]   ;;  %s2107_s8 = inlined_call_operand.hbm [shape: f32[2,8], index: 8, kind: output, shape index: {}]  }
   0x1   :  { %v32_v0 = vld [vmem:[%s2099_s0 + $0x10] sm:$0xff]  ;;  %v30_v1 = vld [vmem:[%s2099_s0] sm:$0xff]  ;;  %1668 = vset.pattern.permute.xlu1 %v1759_v2  ;;  %1667 = vset.pattern.permute.xlu0 %v1759_v2  ;;  %v65_v4 = vld [vmem:[%s2101_s2 + $0x28] sm:$0xff] }
   0x2   :  { %v66_v3 = vld [vmem:[%s2101_s2 + $0x30] sm:$0x3]  ;;  %43 = vperm.xlu1 %1668, %v32_v0   ;;  %37 = vperm.xlu0 %1667, %v30_v1   ;;  %v33_v5 = vld [vmem:[%s2099_s0 + $0x18] sm:$0xff]  ;;  %v31_v6 = vld [vmem:[%s2099_s0 + $0x8] sm:$0xff] }
   0x3   :  { %1520 = vmatprep.subr.msk.mxu0 %vm80_vm0, %v66_v3 }
   0x4   :  { %13 = vsyncpa [#allocation3], 0  ;;  %1521 = vmatpush3.msk.msra.mxu0 %vm80_vm0, %v66_v3  ;;  %v64_v7 = vld [vmem:[%s2101_s2 + $0x20] sm:$0xff]  ;;  %v63_v8 = vld [vmem:[%s2101_s2 + $0x18] sm:$0xff]  ;;  %v1760_v13 = vmov 0.0   ;;  %v34_v14 = vlaneseq  ;;  %vm67_vm1 = vcmask 408576  }
   0x5   :  { %1522 = vmatprep.subr.mxu0 %v65_v4  ;;  %v170_v9 = vld [vmem:[%s2102_s3 + $0x8] sm:$0xff]  ;;  %v62_v10 = vld [vmem:[%s2101_s2 + $0x10] sm:$0xff]  ;;  %v60_v12 = vld [vmem:[%s2101_s2] sm:$0xff]  ;;  %vm1761_vm6 = vmmov 0   ;;  %vm178_vm7 = vcmask 130048   ;;  %s1763_s17 = smov 32  }
   0x6   :  { %46 = vperm.xlu1 %1668, %v33_v5   ;;  %40 = vperm.xlu0 %1667, %v31_v6   ;;  %v61_v11 = vld [vmem:[%s2101_s2 + $0x8] sm:$0xff]  ;;  %v35_v15 = vand.u32 127, %v34_v14  ;;  %v169_v24 = vld [vmem:[%s2102_s3] sm:$0xff]  ;;  %v1861_v25 = vld [vmem:[%s2103_s4 + $0x18] sm:$0xff]  ;;  %vm281_vm10 = vcmask 261120  }
   0x7   :  { %1523 = vmatpush3.msra.mxu0 %v65_v4  ;;  %1540 = vmatprep.subr.mxu1 %v170_v9  ;;  %v1867_v26 = vld [vmem:[%s2103_s4 + $0x10] sm:$0xff]  ;;  %v1874_v27 = vld [vmem:[%s2103_s4 + $0x8] sm:$0xff]  ;;  %v1881_v28 = vld [vmem:[%s2103_s4] sm:$0xff] }
   0x8   :  { %1524 = vmatprep.subr.mxu0 %v64_v7  ;;  %1541 = vmatpush3.msra.mxu1 %v170_v9  ;;  %v1430_v33 = vld [vmem:[%s2104_s5] ss:$0 sm:$0xff]  ;;  %s1762_s5 = smov 64  }
   0x9   :  { %1525 = vmatpush3.msra.mxu0 %v64_v7  ;;  %1542 = vmatprep.subr.mxu1 %v169_v24  ;;  %v1921_v45 = vld [vmem:[%s2100_s1] sm:$0xf]  ;;  %s1764_s1 = smov 96  }
   0xa   :  { %1526 = vmatprep.subr.mxu0 %v63_v8  ;;  %1543 = vmatpush3.msra.mxu1 %v169_v24  ;;  %vm380_vm8 = vcmp.gt.s32.totalorder %v1921_v45, 0  ;;  %vm494_vm11 = vcmp.gt.s32.totalorder %v1921_v45, 1  ;;  %vm618_vm13 = vcmp.gt.s32.totalorder %v1921_v45, 2  ;;  %vm735_vm15 = vcmp.gt.s32.totalorder %v1921_v45, 3 }
   0xb   :  { %1527 = vmatpush3.msra.mxu0 %v63_v8  ;;  %1550 = vmatprep.subr.mxu1 %v1760_v13  ;;  %v381_v47 = vsel %vm380_vm8, 1, %v1759_v2  ;;  %vm1217_vm8 = vcmp.gt.s32.totalorder %v1921_v45, 7 }
   0xc   :  { %1528 = vmatprep.subr.mxu0 %v62_v10 }
   0xd   :  { %1529 = vmatpush3.msra.mxu0 %v62_v10 }
   0xe   :  { %1530 = vmatprep.subr.mxu0 %v61_v11 }
   0xf   :  { %1531 = vmatpush3.msra.mxu0 %v61_v11  ;;  %v495_v11 = vsel %vm494_vm11, 1, %v1759_v2 }
  0x10   :  { %1532 = vmatprep.subr.mxu0 %v60_v12 }
  0x11   :  { %1533 = vmatpush3.msra.mxu0 %v60_v12 }
  0x12   :  { %1572 = vmatprep.subr.mxu0 %v1760_v13 }
  0x7d   :  { %v44_v16 = vpop.permute.xlu1 %43  ;;  %v38_v17 = vpop.permute.xlu0 %37 }
  0x7e   :  { %vm48_vm2 = vcmp.eq.s32.totalorder %v38_v17, %v35_v15  ;;  %vm50_vm3 = vcmp.eq.s32.totalorder %v44_v16, %v35_v15 }
  0x7f   :  { %v1421_v18 = vsel %vm48_vm2, 1.0, %v1760_v13  ;;  %v1423_v21 = vsel %vm50_vm3, 1.0, %v1760_v13  ;;  %vm976_vm3 = vcmp.gt.s32.totalorder %v1921_v45, 5 }
  0x80   :  { %1534 = vmatprep.mubr.msk.f32.mxu0 %vm67_vm1, %v1421_v18 }
  0x81   :  { %v47_v19 = vpop.permute.xlu1 %46  ;;  %v41_v20 = vpop.permute.xlu0 %40 }
  0x82   :  { %vm49_vm4 = vcmp.eq.s32.totalorder %v41_v20, %v35_v15  ;;  %vm51_vm5 = vcmp.eq.s32.totalorder %v47_v19, %v35_v15 }
  0x83   :  { %v1422_v22 = vsel %vm49_vm4, 1.0, %v1760_v13  ;;  %v1424_v23 = vsel %vm51_vm5, 1.0, %v1760_v13  ;;  %vm1100_vm5 = vcmp.gt.s32.totalorder %v1921_v45, 6 }
  0x84   :  { %1535 = vmatmul.mubr.msk.f32.vlgmr.msra.gmra.mxu0 %vm67_vm1, %v1422_v22 }
  0x85   :  { %1537 = vmatprep.mubr.msk.f32.mxu0 %vm67_vm1, %v1423_v21  ;;  %1573 = vmatpush3.msra.mxu0 %v1861_v25 }
  0x86   :  { %1574 = vmatprep.subr.mxu0 %v1760_v13 }
  0x87   :  { %1575 = vmatpush3.msra.mxu0 %v1867_v26 }
  0x88   :  { %1538 = vmatmul.mubr.msk.f32.gmra.mxu0 %vm67_vm1, %v1424_v23  ;;  %1576 = vmatprep.subr.mxu0 %v1760_v13  ;;  %vm859_vm1 = vcmp.gt.s32.totalorder %v1921_v45, 4  ;;  %v1237_v45 = vld [vmem:[%s2105_s6 + $0x38] sm:$0xff] }
  0x89   :  { %1577 = vmatpush3.msra.mxu0 %v1874_v27  ;;  %1580 = vmatprep.mubr.msk.f32.mxu0 %vm1761_vm6, %v1760_v13 }
  0x8a   :  { %1578 = vmatprep.subr.mxu0 %v1760_v13 }
  0x8b   :  { %1579 = vmatpush3.msra.mxu0 %v1881_v28 }
  0x8c   :  { %1594 = vmatprep.subr.mxu0 %v1760_v13 }
 0x144   :  { %v1536_v29 = vpop.f32.mrf.mxu0 }
 0x146   :  { %v150_v30 = vpop.f32.mrf.mxu0 }
 0x147   :  { %1544 = vmatprep.mubr.msk.f32.mxu1 %vm178_vm7, %v150_v30 }
 0x148   :  { %v1539_v31 = vpop.f32.mrf.mxu0  ;;  %1545 = vmatmul.mubr.msk.f32.vlgmr.msra.gmra.mxu1 %vm178_vm7, %v1536_v29 }
 0x149   :  { %1551 = vmatpush3.msra.mxu1 %v1861_v25 }
 0x14a   :  { %1552 = vmatprep.subr.mxu1 %v1760_v13  ;;  %v160_v32 = vpop.f32.mrf.mxu0 }
 0x14b   :  { %1553 = vmatpush3.msra.mxu1 %v1867_v26  ;;  %1547 = vmatprep.mubr.msk.f32.mxu1 %vm178_vm7, %v160_v32 }
 0x14c   :  { %1554 = vmatprep.subr.mxu1 %v1760_v13  ;;  %1548 = vmatmul.mubr.msk.f32.gmra.mxu1 %vm178_vm7, %v1539_v31 }
 0x14d   :  { %1555 = vmatpush3.msra.mxu1 %v1874_v27  ;;  %1558 = vmatprep.mubr.msk.f32.mxu1 %vm1761_vm6, %v1760_v13 }
 0x14e   :  { %1556 = vmatprep.subr.mxu1 %v1760_v13 }
 0x14f   :  { %1557 = vmatpush3.msra.mxu1 %v1881_v28 }
 0x150   :  { %1559 = vmatmul.mubr.f32.vlgmr.msra.gmra.mxu1 %v1760_v13  ;;  %1561 = vmatprep.subr.mxu1 %v1760_v13 }
 0x151   :  { %1562 = vmatpush3.msra.mxu1 %v1861_v25  ;;  %1569 = vmatprep.mubr.msk.f32.mxu1 %vm1761_vm6, %v1760_v13 }
 0x152   :  { %1563 = vmatprep.subr.mxu1 %v1760_v13 }
 0x153   :  { %1564 = vmatpush3.msra.mxu1 %v1867_v26 }
 0x154   :  { %1565 = vmatprep.subr.mxu1 %v1760_v13 }
 0x155   :  { %1566 = vmatpush3.msra.mxu1 %v1874_v27 }
 0x156   :  { %1567 = vmatprep.subr.mxu1 %v1760_v13 }
 0x157   :  { %1568 = vmatpush3.msra.mxu1 %v1881_v28 }
 0x158   :  { %1583 = vmatprep.subr.mxu1 %v1760_v13 }
 0x208   :  { %v1546_v34 = vpop.f32.mrf.mxu1 }
 0x209   :  { %v1912_v35 = vadd.f32 %v1546_v34, %v1430_v33 }
 0x20a   :  { %v257_v36 = vpop.f32.mrf.mxu1 }
 0x20b   :  { %v258_v40 = vadd.f32 %v1430_v33, %v257_v36 }
 0x20c   :  { %v1549_v37 = vpop.f32.mrf.mxu1 }
 0x20d   :  { %v1914_v38 = vadd.f32 %v1549_v37, %v1430_v33 }
 0x20e   :  { %v267_v39 = vpop.f32.mrf.mxu1 }
 0x20f   :  { %v1916_v41 = vadd.f32 %v1430_v33, %v267_v39  ;;  %v619_v33 = vsel %vm618_vm13, 1, %v1759_v2 }
 0x210   :  { %v351_v42 = vpop.f32.mrf.mxu1 }
 0x211   :  { %v355_v43 = vadd.f32 %v351_v42, %v258_v40 }
 0x212   :  { %v1560_v44 = vpop.f32.mrf.mxu1 }
 0x213   :  { %1669 = vtanh.f32 %v355_v43  ;;  %v1435_v48 = vmul.f32 -1.442695, %v355_v43 }
 0x215   :  { %1671 = vpow2.f32 %v1435_v48 }
 0x220   :  { %v1670_v46 = vpop.eup %1669 }
 0x221   :  { %365 = vrot.lane.b32.xlu0 %v1670_v46, %s1762_s5 }
 0x222   :  { %v1672_v49 = vpop.eup %1671 }
 0x223   :  { %v359_v50 = vadd.f32 1.0, %v1672_v49 }
 0x225   :  { %383 = vperm.xlu0 %1667, %v381_v47   ;;  %1673 = vrcp.f32 %v359_v50 }
 0x232   :  { %v1674_v51 = vpop.eup %1673 }
 0x233   :  { %v363_v54 = vmul.f32 0.0, %v1674_v51 }
 0x293   :  { %v366_v52 = vpop.permute.xlu0 %365 }
 0x294   :  { %v368_v53 = vmul.f32 %v1674_v51, %v366_v52 }
 0x296   :  { %370 = vrot.lane.b32.xlu1 %v368_v53, %s1763_s17 }
 0x2a0   :  { %v384_v58 = vpop.permute.xlu0 %383 }
 0x2a1   :  { %vm385_vm9 = vcmp.eq.s32.totalorder %v384_v58, 1 }
 0x308   :  { %v371_v55 = vpop.permute.xlu1 %370 }
 0x309   :  { %v373_v56 = vadd.f32 %v371_v55, %v363_v54 }
 0x30b   :  { %1675 = vtanh.f32 %v373_v56  ;;  %v387_v12 = vsel %vm385_vm9, %v373_v56, 0.0 }
 0x30c   :  { %v475_v14 = vrot.slane %v387_v12, 4 }
 0x318   :  { %v1676_v57 = vpop.eup %1675 }
 0x319   :  { %376 = vrot.lane.b32.xlu1 %v1676_v57, %s1762_s5 }
 0x38b   :  { %v377_v59 = vpop.permute.xlu1 %376 }
 0x38c   :  { %v379_v60 = vmul.f32 %v1674_v51, %v377_v59 }
 0x38e   :  { %v386_v61 = vsel %vm385_vm9, %v379_v60, 0.0  ;;  %vm1392_vm9 = vcmask 58368  }
 0x38f   :  { %389 = vrot.lane.b32.xlu0 %v386_v61, %s1763_s17 }
 0x401   :  { %v390_v62 = vpop.permute.xlu0 %389 }
 0x402   :  { %1570 = vmatmul.mubr.msk.f32.vlgmr.msra.gmra.mxu1 %vm281_vm10, %v390_v62 }
 0x403   :  { %1584 = vmatpush3.msra.mxu1 %v1861_v25  ;;  %1591 = vmatprep.mubr.msk.f32.mxu1 %vm1761_vm6, %v1760_v13 }
 0x404   :  { %1585 = vmatprep.subr.mxu1 %v1760_v13 }
 0x405   :  { %1586 = vmatpush3.msra.mxu1 %v1867_v26 }
 0x406   :  { %1587 = vmatprep.subr.mxu1 %v1760_v13 }
 0x407   :  { %1588 = vmatpush3.msra.mxu1 %v1874_v27 }
 0x408   :  { %1589 = vmatprep.subr.mxu1 %v1760_v13 }
 0x409   :  { %1590 = vmatpush3.msra.mxu1 %v1881_v28 }
 0x40a   :  { %1605 = vmatprep.subr.mxu1 %v1760_v13 }
 0x4c2   :  { %v459_v63 = vpop.f32.mrf.mxu1 }
 0x4c3   :  { %v464_v0 = vrot.slane %v459_v63, 4 }
 0x4c4   :  { %v1571_v1 = vpop.f32.mrf.mxu1 }
 0x4c5   :  { %v466_v3 = vadd.f32 %v464_v0, %v258_v40 }
 0x4c7   :  { %1677 = vtanh.f32 %v466_v3  ;;  %v1437_v5 = vmul.f32 -1.442695, %v466_v3 }
 0x4c9   :  { %1679 = vpow2.f32 %v1437_v5 }
 0x4d4   :  { %v1678_v4 = vpop.eup %1677 }
 0x4d5   :  { %479 = vrot.lane.b32.xlu1 %v1678_v4, %s1762_s5 }
 0x4d6   :  { %v1680_v6 = vpop.eup %1679 }
 0x4d7   :  { %v470_v7 = vadd.f32 1.0, %v1680_v6 }
 0x4d9   :  { %1681 = vrcp.f32 %v470_v7  ;;  %v736_v7 = vsel %vm735_vm15, 1, %v1759_v2 }
 0x4e6   :  { %v1682_v8 = vpop.eup %1681 }
 0x4e7   :  { %v477_v15 = vmul.f32 %v1682_v8, %v475_v14 }
 0x547   :  { %v480_v9 = vpop.permute.xlu1 %479 }
 0x548   :  { %v482_v10 = vmul.f32 %v1682_v8, %v480_v9 }
 0x54a   :  { %484 = vrot.lane.b32.xlu0 %v482_v10, %s1763_s17 }
 0x54e   :  { %497 = vperm.xlu0 %1667, %v495_v11  }
 0x5bc   :  { %v485_v16 = vpop.permute.xlu0 %484 }
 0x5bd   :  { %v487_v17 = vadd.f32 %v485_v16, %v477_v15 }
 0x5bf   :  { %1683 = vtanh.f32 %v487_v17  ;;  %v508_v18 = vrot.slane %v487_v17, 4 }
 0x5c1   :  { %509 = vrot.lane.b32.xlu0 %v508_v18, %s1764_s1 }
 0x5c9   :  { %v498_v23 = vpop.permute.xlu0 %497 }
 0x5ca   :  { %vm499_vm12 = vcmp.eq.s32.totalorder %v498_v23, 1 }
 0x5cc   :  { %v1684_v19 = vpop.eup %1683 }
 0x5cd   :  { %490 = vrot.lane.b32.xlu1 %v1684_v19, %s1762_s5 }
 0x633   :  { %v510_v30 = vpop.permute.xlu0 %509 }
 0x63f   :  { %v491_v20 = vpop.permute.xlu1 %490 }
 0x640   :  { %v493_v21 = vmul.f32 %v1682_v8, %v491_v20 }
 0x642   :  { %v501_v22 = vrot.slane %v493_v21, 4 }
 0x644   :  { %502 = vrot.lane.b32.xlu1 %v501_v22, %s1763_s17 }
 0x648   :  { %512 = vrot.lane.b32.xlu1 %v387_v12, %s1764_s1 }
 0x6b6   :  { %v503_v24 = vpop.permute.xlu1 %502 }
 0x6b7   :  { %v506_v29 = vsel %vm499_vm12, %v503_v24, %v390_v62  ;;  %v860_v24 = vsel %vm859_vm1, 1, %v1759_v2 }
 0x6b8   :  { %1581 = vmatmul.mubr.msk.f32.vlgmr.msra.gmra.mxu0 %vm281_vm10, %v506_v29 }
 0x6b9   :  { %1595 = vmatpush3.msra.mxu0 %v1861_v25  ;;  %1602 = vmatprep.mubr.msk.f32.mxu0 %vm1761_vm6, %v1760_v13 }
 0x6ba   :  { %v513_v31 = vpop.permute.xlu1 %512  ;;  %1596 = vmatprep.subr.mxu0 %v1760_v13 }
 0x6bb   :  { %v515_v32 = vsel %vm499_vm12, %v510_v30, %v513_v31  ;;  %1597 = vmatpush3.msra.mxu0 %v1867_v26 }
 0x6bc   :  { %598 = vrot.lane.b32.xlu1 %v515_v32, %s1763_s17  ;;  %1598 = vmatprep.subr.mxu0 %v1760_v13 }
 0x6bd   :  { %1599 = vmatpush3.msra.mxu0 %v1874_v27 }
 0x6be   :  { %1600 = vmatprep.subr.mxu0 %v1760_v13 }
 0x6bf   :  { %1601 = vmatpush3.msra.mxu0 %v1881_v28 }
 0x6c0   :  { %621 = vperm.xlu1 %1668, %v619_v33   ;;  %1616 = vmatprep.subr.mxu0 %v1760_v13 }
 0x6c4   :  { %624 = vrot.lane.b32.xlu1 %v506_v29, %s1764_s1 }
 0x72e   :  { %v599_v48 = vpop.permute.xlu1 %598 }
 0x73b   :  { %v622_v53 = vpop.permute.xlu1 %621 }
 0x73c   :  { %vm623_vm14 = vcmp.eq.s32.totalorder %v622_v53, 1 }
 0x73f   :  { %v625_v56 = vpop.permute.xlu1 %624 }
 0x778   :  { %v585_v34 = vpop.f32.mrf.mxu0 }
 0x779   :  { %v589_v36 = vadd.f32 %v585_v34, %v1912_v35 }
 0x77a   :  { %v1582_v37 = vpop.f32.mrf.mxu0 }
 0x77b   :  { %1685 = vtanh.f32 %v589_v36  ;;  %v1439_v40 = vmul.f32 -1.442695, %v589_v36 }
 0x77d   :  { %1687 = vpow2.f32 %v1439_v40 }
 0x788   :  { %v1686_v39 = vpop.eup %1685 }
 0x789   :  { %603 = vrot.lane.b32.xlu0 %v1686_v39, %s1762_s5 }
 0x78a   :  { %v1688_v42 = vpop.eup %1687 }
 0x78b   :  { %v593_v43 = vadd.f32 1.0, %v1688_v42 }
 0x78d   :  { %1689 = vrcp.f32 %v593_v43 }
 0x79a   :  { %v1690_v44 = vpop.eup %1689 }
 0x79b   :  { %v601_v49 = vmul.f32 %v1690_v44, %v599_v48 }
 0x7fb   :  { %v604_v46 = vpop.permute.xlu0 %603 }
 0x7fc   :  { %v606_v47 = vmul.f32 %v1690_v44, %v604_v46 }
 0x7fe   :  { %608 = vrot.lane.b32.xlu0 %v606_v47, %s1763_s17 }
 0x870   :  { %v609_v50 = vpop.permute.xlu0 %608 }
 0x871   :  { %v611_v51 = vadd.f32 %v609_v50, %v601_v49 }
 0x873   :  { %1691 = vtanh.f32 %v611_v51 }
 0x880   :  { %v1692_v52 = vpop.eup %1691 }
 0x881   :  { %614 = vrot.lane.b32.xlu0 %v1692_v52, %s1762_s5 }
 0x8f3   :  { %v615_v54 = vpop.permute.xlu0 %614 }
 0x8f4   :  { %v617_v55 = vmul.f32 %v1690_v44, %v615_v54 }
 0x8f6   :  { %v627_v57 = vsel %vm623_vm14, %v617_v55, %v625_v56 }
 0x8f7   :  { %630 = vrot.lane.b32.xlu0 %v627_v57, %s1763_s17 }
 0x969   :  { %v631_v58 = vpop.permute.xlu0 %630 }
 0x96a   :  { %1592 = vmatmul.mubr.msk.f32.vlgmr.msra.gmra.mxu1 %vm281_vm10, %v631_v58 }
 0x96b   :  { %1606 = vmatpush3.msra.mxu1 %v1861_v25  ;;  %1613 = vmatprep.mubr.msk.f32.mxu1 %vm1761_vm6, %v1760_v13 }
 0x96c   :  { %1607 = vmatprep.subr.mxu1 %v1760_v13 }
 0x96d   :  { %1608 = vmatpush3.msra.mxu1 %v1867_v26 }
 0x96e   :  { %1609 = vmatprep.subr.mxu1 %v1760_v13 }
 0x96f   :  { %1610 = vmatpush3.msra.mxu1 %v1874_v27 }
 0x970   :  { %1611 = vmatprep.subr.mxu1 %v1760_v13 }
 0x971   :  { %1612 = vmatpush3.msra.mxu1 %v1881_v28 }
 0x972   :  { %1627 = vmatprep.subr.mxu1 %v1760_v13 }
 0xa2a   :  { %v700_v59 = vpop.f32.mrf.mxu1 }
 0xa2b   :  { %v705_v60 = vrot.slane %v700_v59, 4 }
 0xa2c   :  { %v1593_v61 = vpop.f32.mrf.mxu1 }
 0xa2d   :  { %v707_v62 = vadd.f32 %v705_v60, %v1912_v35  ;;  %v628_v35 = vsel %vm623_vm14, %v611_v51, %v599_v48 }
 0xa2e   :  { %v716_v8 = vrot.slane %v628_v35, 4 }
 0xa2f   :  { %1693 = vtanh.f32 %v707_v62  ;;  %v1441_v0 = vmul.f32 -1.442695, %v707_v62 }
 0xa31   :  { %1695 = vpow2.f32 %v1441_v0 }
 0xa3c   :  { %v1694_v63 = vpop.eup %1693 }
 0xa3d   :  { %720 = vrot.lane.b32.xlu1 %v1694_v63, %s1762_s5 }
 0xa3e   :  { %v1696_v1 = vpop.eup %1695 }
 0xa3f   :  { %v711_v3 = vadd.f32 1.0, %v1696_v1 }
 0xa41   :  { %1697 = vrcp.f32 %v711_v3 }
 0xa4e   :  { %v1698_v4 = vpop.eup %1697 }
 0xa4f   :  { %v718_v9 = vmul.f32 %v1698_v4, %v716_v8 }
 0xaaf   :  { %v721_v5 = vpop.permute.xlu1 %720 }
 0xab0   :  { %v723_v6 = vmul.f32 %v1698_v4, %v721_v5 }
 0xab2   :  { %725 = vrot.lane.b32.xlu0 %v723_v6, %s1763_s17 }
 0xab6   :  { %738 = vperm.xlu0 %1667, %v736_v7  }
 0xb24   :  { %v726_v10 = vpop.permute.xlu0 %725 }
 0xb25   :  { %v728_v11 = vadd.f32 %v726_v10, %v718_v9 }
 0xb27   :  { %1699 = vtanh.f32 %v728_v11  ;;  %v749_v12 = vrot.slane %v728_v11, 4 }
 0xb29   :  { %750 = vrot.lane.b32.xlu0 %v749_v12, %s1764_s1 }
 0xb31   :  { %v739_v18 = vpop.permute.xlu0 %738 }
 0xb32   :  { %vm740_vm0 = vcmp.eq.s32.totalorder %v739_v18, 1 }
 0xb34   :  { %v1700_v14 = vpop.eup %1699 }
 0xb35   :  { %731 = vrot.lane.b32.xlu1 %v1700_v14, %s1762_s5  ;;  %v1101_v14 = vsel %vm1100_vm5, 1, %v1759_v2 }
 0xb9b   :  { %v751_v21 = vpop.permute.xlu0 %750 }
 0xba7   :  { %v732_v15 = vpop.permute.xlu1 %731 }
 0xba8   :  { %v734_v16 = vmul.f32 %v1698_v4, %v732_v15 }
 0xbaa   :  { %v742_v17 = vrot.slane %v734_v16, 4 }
 0xbac   :  { %743 = vrot.lane.b32.xlu1 %v742_v17, %s1763_s17 }
 0xbb0   :  { %753 = vrot.lane.b32.xlu1 %v628_v35, %s1764_s1 }
 0xc1e   :  { %v744_v19 = vpop.permute.xlu1 %743 }
 0xc1f   :  { %v747_v20 = vsel %vm740_vm0, %v744_v19, %v631_v58 }
 0xc20   :  { %1603 = vmatmul.mubr.msk.f32.vlgmr.msra.gmra.mxu0 %vm281_vm10, %v747_v20 }
 0xc21   :  { %1617 = vmatpush3.msra.mxu0 %v1861_v25  ;;  %1624 = vmatprep.mubr.msk.f32.mxu0 %vm1761_vm6, %v1760_v13 }
 0xc22   :  { %v754_v22 = vpop.permute.xlu1 %753  ;;  %1618 = vmatprep.subr.mxu0 %v1760_v13 }
 0xc23   :  { %v756_v23 = vsel %vm740_vm0, %v751_v21, %v754_v22  ;;  %1619 = vmatpush3.msra.mxu0 %v1867_v26 }
 0xc24   :  { %839 = vrot.lane.b32.xlu1 %v756_v23, %s1763_s17  ;;  %1620 = vmatprep.subr.mxu0 %v1760_v13 }
 0xc25   :  { %1621 = vmatpush3.msra.mxu0 %v1874_v27 }
 0xc26   :  { %1622 = vmatprep.subr.mxu0 %v1760_v13 }
 0xc27   :  { %1623 = vmatpush3.msra.mxu0 %v1881_v28 }
 0xc28   :  { %862 = vperm.xlu1 %1668, %v860_v24   ;;  %1638 = vmatprep.subr.mxu0 %v1760_v13 }
 0xc2c   :  { %865 = vrot.lane.b32.xlu1 %v747_v20, %s1764_s1 }
 0xc96   :  { %v840_v42 = vpop.permute.xlu1 %839 }
 0xca3   :  { %v863_v48 = vpop.permute.xlu1 %862 }
 0xca4   :  { %vm864_vm2 = vcmp.eq.s32.totalorder %v863_v48, 1 }
 0xca7   :  { %v866_v51 = vpop.permute.xlu1 %865 }
 0xce0   :  { %v826_v29 = vpop.f32.mrf.mxu0 }
 0xce1   :  { %v830_v30 = vadd.f32 %v826_v29, %v1916_v41 }
 0xce2   :  { %v1604_v31 = vpop.f32.mrf.mxu0 }
 0xce3   :  { %1701 = vtanh.f32 %v830_v30  ;;  %v1443_v33 = vmul.f32 -1.442695, %v830_v30 }
 0xce5   :  { %1703 = vpow2.f32 %v1443_v33 }
 0xcf0   :  { %v1702_v32 = vpop.eup %1701 }
 0xcf1   :  { %844 = vrot.lane.b32.xlu0 %v1702_v32, %s1762_s5 }
 0xcf2   :  { %v1704_v34 = vpop.eup %1703 }
 0xcf3   :  { %v834_v36 = vadd.f32 1.0, %v1704_v34 }
 0xcf5   :  { %1705 = vrcp.f32 %v834_v36 }
 0xd02   :  { %v1706_v37 = vpop.eup %1705 }
 0xd03   :  { %v842_v43 = vmul.f32 %v1706_v37, %v840_v42 }
 0xd63   :  { %v845_v39 = vpop.permute.xlu0 %844 }
 0xd64   :  { %v847_v40 = vmul.f32 %v1706_v37, %v845_v39 }
 0xd66   :  { %849 = vrot.lane.b32.xlu0 %v847_v40, %s1763_s17 }
 0xdd8   :  { %v850_v44 = vpop.permute.xlu0 %849 }
 0xdd9   :  { %v852_v46 = vadd.f32 %v850_v44, %v842_v43 }
 0xddb   :  { %1707 = vtanh.f32 %v852_v46 }
 0xde8   :  { %v1708_v47 = vpop.eup %1707 }
 0xde9   :  { %855 = vrot.lane.b32.xlu0 %v1708_v47, %s1762_s5 }
 0xe5b   :  { %v856_v49 = vpop.permute.xlu0 %855 }
 0xe5c   :  { %v858_v50 = vmul.f32 %v1706_v37, %v856_v49 }
 0xe5e   :  { %v868_v52 = vsel %vm864_vm2, %v858_v50, %v866_v51 }
 0xe5f   :  { %871 = vrot.lane.b32.xlu0 %v868_v52, %s1763_s17 }
 0xed1   :  { %v872_v53 = vpop.permute.xlu0 %871 }
 0xed2   :  { %1614 = vmatmul.mubr.msk.f32.vlgmr.msra.gmra.mxu1 %vm281_vm10, %v872_v53 }
 0xed3   :  { %1628 = vmatpush3.msra.mxu1 %v1861_v25  ;;  %1635 = vmatprep.mubr.msk.f32.mxu1 %vm1761_vm6, %v1760_v13 }
 0xed4   :  { %1629 = vmatprep.subr.mxu1 %v1760_v13 }
 0xed5   :  { %1630 = vmatpush3.msra.mxu1 %v1867_v26 }
 0xed6   :  { %1631 = vmatprep.subr.mxu1 %v1760_v13 }
 0xed7   :  { %1632 = vmatpush3.msra.mxu1 %v1874_v27 }
 0xed8   :  { %1633 = vmatprep.subr.mxu1 %v1760_v13 }
 0xed9   :  { %1634 = vmatpush3.msra.mxu1 %v1881_v28  ;;  %v977_v28 = vsel %vm976_vm3, 1, %v1759_v2 }
 0xeda   :  { %1649 = vmatprep.subr.mxu1 %v1760_v13 }
 0xf92   :  { %v941_v54 = vpop.f32.mrf.mxu1 }
 0xf93   :  { %v946_v55 = vrot.slane %v941_v54, 4 }
 0xf94   :  { %v1615_v25 = vpop.f32.mrf.mxu1 }
 0xf95   :  { %v948_v56 = vadd.f32 %v946_v55, %v1916_v41  ;;  %v869_v41 = vsel %vm864_vm2, %v852_v46, %v840_v42  ;;  %v1218_v55 = vsel %vm1217_vm8, 1, %v1759_v2  ;;  %v1232_v2 = vld [vmem:[%s2105_s6 + $0x10] sm:$0xff] }
 0xf96   :  { %v957_v62 = vrot.slane %v869_v41, 4 }
 0xf97   :  { %1709 = vtanh.f32 %v948_v56  ;;  %v1445_v26 = vmul.f32 -1.442695, %v948_v56 }
 0xf99   :  { %1711 = vpow2.f32 %v1445_v26 }
 0xfa4   :  { %v1710_v57 = vpop.eup %1709 }
 0xfa5   :  { %961 = vrot.lane.b32.xlu1 %v1710_v57, %s1762_s5 }
 0xfa6   :  { %v1712_v58 = vpop.eup %1711 }
 0xfa7   :  { %v952_v59 = vadd.f32 1.0, %v1712_v58  ;;  %v1233_v58 = vld [vmem:[%s2105_s6 + $0x18] sm:$0xff] }
 0xfa9   :  { %1713 = vrcp.f32 %v952_v59  ;;  %v1236_v59 = vld [vmem:[%s2105_s6 + $0x30] sm:$0xff] }
 0xfb6   :  { %v1714_v27 = vpop.eup %1713 }
 0xfb7   :  { %v959_v63 = vmul.f32 %v1714_v27, %v957_v62 }
0x1017   :  { %v962_v60 = vpop.permute.xlu1 %961 }
0x1018   :  { %v964_v61 = vmul.f32 %v1714_v27, %v962_v60 }
0x101a   :  { %966 = vrot.lane.b32.xlu0 %v964_v61, %s1763_s17  ;;  %v1235_v61 = vld [vmem:[%s2105_s6 + $0x28] sm:$0xff] }
0x101e   :  { %979 = vperm.xlu0 %1667, %v977_v28   ;;  %v1230_v28 = vld [vmem:[%s2105_s6] sm:$0xff] }
0x108c   :  { %v967_v0 = vpop.permute.xlu0 %966 }
0x108d   :  { %v969_v1 = vadd.f32 %v967_v0, %v959_v63 }
0x108f   :  { %1715 = vtanh.f32 %v969_v1  ;;  %v990_v3 = vrot.slane %v969_v1, 4 }
0x1091   :  { %991 = vrot.lane.b32.xlu0 %v990_v3, %s1764_s1 }
0x1099   :  { %v980_v35 = vpop.permute.xlu0 %979 }
0x109a   :  { %vm981_vm4 = vcmp.eq.s32.totalorder %v980_v35, 1 }
0x109c   :  { %v1716_v4 = vpop.eup %1715 }
0x109d   :  { %972 = vrot.lane.b32.xlu1 %v1716_v4, %s1762_s5 }
0x1103   :  { %v992_v10 = vpop.permute.xlu0 %991 }
0x110f   :  { %v973_v5 = vpop.permute.xlu1 %972 }
0x1110   :  { %v975_v6 = vmul.f32 %v1714_v27, %v973_v5  ;;  %v1231_v27 = vld [vmem:[%s2105_s6 + $0x8] sm:$0xff] }
0x1112   :  { %v983_v7 = vrot.slane %v975_v6, 4 }
0x1114   :  { %984 = vrot.lane.b32.xlu1 %v983_v7, %s1763_s17  ;;  %v1452_v7 = vld [vmem:[%s2106_s7] ss:$0 sm:$0xff] }
0x1118   :  { %994 = vrot.lane.b32.xlu1 %v869_v41, %s1764_s1  ;;  %v1234_v41 = vld [vmem:[%s2105_s6 + $0x20] sm:$0xff]  ;;  %s1765_s6 = smov [#allocation2]  }
0x1119   :  { %s1413_s7 = sshll.u32 %s1765_s6, 4  ;;  %s1414_s7 = int_to_ptr.vmem [resolvable:$true] %s1413_s7 }
0x111a   :  { %s1737_s11 = scalar_lea.vmem %s1414_s7, 32  ;;  %p1742_p1 = scmp.lt.s32.totalorder %s1414_s7, %s1414_s7 }
0x111b   :  { %p1738_p0 = scmp.ne.s32.totalorder %s1414_s7, %s1737_s11  ;;  %p1743_p2 = scmp.lt.s32.totalorder %s1737_s11, %s1737_s11 }
0x111d   :  { %p1744_p3 = por %p1743_p2, %p1742_p1 }
0x111f   :  { %p1745_p4 = pnand %p1744_p3, %p1738_p0 }
0x1186   :  { %v985_v8 = vpop.permute.xlu1 %984 }
0x1187   :  { %v988_v9 = vsel %vm981_vm4, %v985_v8, %v872_v53 }
0x1188   :  { %1625 = vmatmul.mubr.msk.f32.vlgmr.msra.gmra.mxu0 %vm281_vm10, %v988_v9 }
0x1189   :  { %1646 = vmatprep.mubr.msk.f32.mxu0 %vm1761_vm6, %v1760_v13  ;;  %1639 = vmatpush3.msra.mxu0 %v1237_v45 }
0x118a   :  { %v995_v11 = vpop.permute.xlu1 %994  ;;  %1640 = vmatprep.subr.mxu0 %v1760_v13 }
0x118b   :  { %v997_v12 = vsel %vm981_vm4, %v992_v10, %v995_v11  ;;  %1641 = vmatpush3.msra.mxu0 %v1236_v59 }
0x118c   :  { %1080 = vrot.lane.b32.xlu1 %v997_v12, %s1763_s17  ;;  %1642 = vmatprep.subr.mxu0 %v1760_v13 }
0x118d   :  { %1643 = vmatpush3.msra.mxu0 %v1235_v61 }
0x118e   :  { %1644 = vmatprep.subr.mxu0 %v1760_v13 }
0x118f   :  { %1645 = vmatpush3.msra.mxu0 %v1234_v41 }
0x1190   :  { %1103 = vperm.xlu1 %1668, %v1101_v14  }
0x1194   :  { %1106 = vrot.lane.b32.xlu1 %v988_v9, %s1764_s1 }
0x11fe   :  { %v1081_v29 = vpop.permute.xlu1 %1080 }
0x120b   :  { %v1104_v34 = vpop.permute.xlu1 %1103 }
0x120c   :  { %vm1105_vm7 = vcmp.eq.s32.totalorder %v1104_v34, 1 }
0x120f   :  { %v1107_v39 = vpop.permute.xlu1 %1106 }
0x1248   :  { %v1067_v15 = vpop.f32.mrf.mxu0 }
0x1249   :  { %v1071_v16 = vadd.f32 %v1067_v15, %v1914_v38 }
0x124a   :  { %v1626_v17 = vpop.f32.mrf.mxu0 }
0x124b   :  { %1717 = vtanh.f32 %v1071_v16  ;;  %v1447_v19 = vmul.f32 -1.442695, %v1071_v16 }
0x124d   :  { %1719 = vpow2.f32 %v1447_v19 }
0x1258   :  { %v1718_v18 = vpop.eup %1717 }
0x1259   :  { %1085 = vrot.lane.b32.xlu0 %v1718_v18, %s1762_s5 }
0x125a   :  { %v1720_v20 = vpop.eup %1719 }
0x125b   :  { %v1075_v21 = vadd.f32 1.0, %v1720_v20 }
0x125d   :  { %1721 = vrcp.f32 %v1075_v21 }
0x126a   :  { %v1722_v22 = vpop.eup %1721 }
0x126b   :  { %v1083_v30 = vmul.f32 %v1722_v22, %v1081_v29 }
0x12cb   :  { %v1086_v23 = vpop.permute.xlu0 %1085 }
0x12cc   :  { %v1088_v24 = vmul.f32 %v1722_v22, %v1086_v23 }
0x12ce   :  { %1090 = vrot.lane.b32.xlu0 %v1088_v24, %s1763_s17 }
0x1340   :  { %v1091_v31 = vpop.permute.xlu0 %1090 }
0x1341   :  { %v1093_v32 = vadd.f32 %v1091_v31, %v1083_v30 }
0x1343   :  { %1723 = vtanh.f32 %v1093_v32 }
0x1350   :  { %v1724_v33 = vpop.eup %1723 }
0x1351   :  { %1096 = vrot.lane.b32.xlu0 %v1724_v33, %s1762_s5 }
0x13c3   :  { %v1097_v36 = vpop.permute.xlu0 %1096 }
0x13c4   :  { %v1099_v37 = vmul.f32 %v1722_v22, %v1097_v36 }
0x13c6   :  { %v1109_v40 = vsel %vm1105_vm7, %v1099_v37, %v1107_v39 }
0x13c7   :  { %1112 = vrot.lane.b32.xlu0 %v1109_v40, %s1763_s17 }
0x1439   :  { %v1113_v42 = vpop.permute.xlu0 %1112 }
0x143a   :  { %1636 = vmatmul.mubr.msk.f32.vlgmr.msra.gmra.mxu1 %vm281_vm10, %v1113_v42 }
0x143b   :  { %1657 = vmatprep.mubr.msk.f32.mxu1 %vm1761_vm6, %v1760_v13  ;;  %1650 = vmatpush3.msra.mxu1 %v1233_v58 }
0x143c   :  { %1651 = vmatprep.subr.mxu1 %v1760_v13 }
0x143d   :  { %1652 = vmatpush3.msra.mxu1 %v1232_v2 }
0x143e   :  { %1653 = vmatprep.subr.mxu1 %v1760_v13 }
0x143f   :  { %1654 = vmatpush3.msra.mxu1 %v1231_v27 }
0x1440   :  { %1655 = vmatprep.subr.mxu1 %v1760_v13 }
0x1441   :  { %1656 = vmatpush3.msra.mxu1 %v1230_v28 }
0x14fa   :  { %v1182_v43 = vpop.f32.mrf.mxu1 }
0x14fb   :  { %v1187_v44 = vrot.slane %v1182_v43, 4 }
0x14fc   :  { %v1637_v46 = vpop.f32.mrf.mxu1 }
0x14fd   :  { %v1189_v47 = vadd.f32 %v1187_v44, %v1914_v38  ;;  %v1110_v38 = vsel %vm1105_vm7, %v1093_v32, %v1081_v29 }
0x14fe   :  { %v1198_v25 = vrot.slane %v1110_v38, 4 }
0x14ff   :  { %1725 = vtanh.f32 %v1189_v47  ;;  %v1449_v49 = vmul.f32 -1.442695, %v1189_v47 }
0x1501   :  { %1727 = vpow2.f32 %v1449_v49 }
0x150c   :  { %v1726_v48 = vpop.eup %1725 }
0x150d   :  { %1202 = vrot.lane.b32.xlu1 %v1726_v48, %s1762_s5 }
0x150e   :  { %v1728_v50 = vpop.eup %1727 }
0x150f   :  { %v1193_v51 = vadd.f32 1.0, %v1728_v50 }
0x1511   :  { %1729 = vrcp.f32 %v1193_v51 }
0x151e   :  { %v1730_v52 = vpop.eup %1729 }
0x151f   :  { %v1200_v56 = vmul.f32 %v1730_v52, %v1198_v25 }
0x157f   :  { %v1203_v53 = vpop.permute.xlu1 %1202 }
0x1580   :  { %v1205_v54 = vmul.f32 %v1730_v52, %v1203_v53 }
0x1582   :  { %1207 = vrot.lane.b32.xlu0 %v1205_v54, %s1763_s17 }
0x1586   :  { %1220 = vperm.xlu0 %1667, %v1218_v55  }
0x15f4   :  { %v1208_v57 = vpop.permute.xlu0 %1207 }
0x15f5   :  { %v1210_v26 = vadd.f32 %v1208_v57, %v1200_v56 }
0x15f7   :  { %1731 = vtanh.f32 %v1210_v26 }
0x1601   :  { %v1221_v1 = vpop.permute.xlu0 %1220 }
0x1602   :  { %vm1222_vm6 = vcmp.eq.s32.totalorder %v1221_v1, 1 }
0x1604   :  { %v1732_v60 = vpop.eup %1731 }
0x1605   :  { %1213 = vrot.lane.b32.xlu1 %v1732_v60, %s1762_s5 }
0x1677   :  { %v1214_v62 = vpop.permute.xlu1 %1213 }
0x1678   :  { %v1216_v63 = vmul.f32 %v1730_v52, %v1214_v62 }
0x167a   :  { %v1224_v0 = vrot.slane %v1216_v63, 4 }
0x167c   :  { %1225 = vrot.lane.b32.xlu1 %v1224_v0, %s1763_s17 }
0x16ee   :  { %v1226_v3 = vpop.permute.xlu1 %1225 }
0x16ef   :  { %v1229_v4 = vsel %vm1222_vm6, %v1226_v3, %v1113_v42 }
0x16f0   :  { %v1239_v5 = vrot.slane %v1229_v4, 2  ;;  %1658 = vmatmul.mubr.msk.f32.vlgmr.msra.gmra.mxu1 %vm281_vm10, %v1229_v4 }
0x16f2   :  { %1647 = vmatmul.mubr.msk.f32.vlgmr.msra.gmra.mxu0 %vm281_vm10, %v1239_v5 }
0x17b0   :  { %v1380_v13 = vpop.f32.mrf.mxu1 }
0x17b2   :  { %v1308_v6 = vpop.f32.mrf.mxu0  ;;  %v1659_v35 = vpop.f32.mrf.mxu1 }
0x17b3   :  { %v1381_v8 = vadd.f32 %v1380_v13, %v1308_v6 }
0x17b4   :  { %v1648_v9 = vpop.f32.mrf.mxu0 }
0x17b5   :  { %v1391_v10 = vadd.f32 %v1452_v7, %v1381_v8 }
0x17b7   :  { %v1393_v11 = vsel %vm1392_vm9, %v1391_v10, -inf }
0x17b8   :  { %1394 = vmax.xlane.f32.xlu0 %v1393_v11 }
0x1841   :  { %v1395_v12 = vpop.xlane.xlu0 %1394 }
0x1842   :  { %v1396_v14 = vsub.f32 %v1391_v10, %v1395_v12 }
0x1844   :  { %v1397_v15 = vmul.f32 1.442695, %v1396_v14 }
0x1846   :  { %1733 = vpow2.f32 %v1397_v15 }
0x1853   :  { %v1734_v16 = vpop.eup %1733 }
0x1854   :  { %v1399_v17 = vsel %vm1392_vm9, %v1734_v16, 0.0 }
0x1855   :  { %1400 = vadd.xlane.f32.xlu1 %v1399_v17 }
0x18de   :  { %v1401_v18 = vpop.xlane.xlu1 %1400 }
0x18df   :  { %1735 = vlog2.f32 %v1401_v18 }
0x18ec   :  { %v1736_v19 = vpop.eup %1735 }
0x18ed   :  { %v1403_v20 = vmul.f32 0.6931472, %v1736_v19 }
0x18ef   :  { %v1404_v21 = vadd.f32 %v1403_v20, %v1395_v12 }
0x18f1   :  { %v1405_v22 = vsub.f32 %v1391_v10, %v1404_v21 }
0x18f3   :  { %1406 = vst.msk [vmem:[#allocation2] sm:$0x3] %vm1392_vm9, %v1405_v22 }
0x18f4   :  { %1748 = shalt.err (!%p1745_p4)
}
0x18f5   :  { %1416 = dma.vmem_to_hbm [thread:$0]  %s1414_s7, 32, %s2107_s8, [#allocation3]  }
0x18f6   :  { %1757 = dma.done.wait [#allocation3], 32  }
0x18f7   :  { %1758 = vsyncadd [#allocation3], 4294967264 }
0x18f8   :  { %1420 = vsyncpa [#allocation3], 1 }

</bundles_post_ra>
